<compile_context>
chip_gen: v7x
topology: tpu7x:2x2x1
jax: 0.10.0
libtpu: 0.0.40
codegen_flags: <defaults>
</compile_context>

<pallas_src>
import jax
import jax.numpy as jnp
from jax import lax
from jax.experimental import pallas as pl
from jax.experimental.pallas import tpu as pltpu


def _round_up(x, m):
    return ((x + m - 1) // m) * m


def _make_kernel(layer_dims):
    """layer_dims: list of (out_features, in_features), PyTorch Linear layout."""
    n_layers = len(layer_dims)

    def kernel(x_ref, w_ref, b_ref, o_ref):
        # x_ref: [batch_tile, in_dim]           (natural layout)
        # w_ref: [L, WP, WP]  zero-padded, each slot holds W_l at [:out, :in]
        # b_ref: [L, WP, 1]   zero-padded column biases
        # o_ref: [batch_tile, out_dim]          (natural layout)
        h = x_ref[...].astype(jnp.float32)     # [bt, in]
        for idx, (dout, din) in enumerate(layer_dims):
            w = w_ref[idx, :dout, :din]         # static slice of the packed weights
            b = b_ref[idx, :dout, :]            # [dout, 1] -> broadcasts along lanes
            if idx == 0:
                # Contract the shared `in` axis of W [dout, in] and x [bt, in]:
                # produces the lane-dense [dout, bt] layout without an x^T pass.
                z = lax.dot_general(
                    w, h, dimension_numbers=(((1,), (1,)), ((), ())),
                    preferred_element_type=jnp.float32)
            else:
                z = jnp.dot(w, h, preferred_element_type=jnp.float32)
            z = z + b
            if idx != n_layers - 1:
                z = jnp.maximum(z, 0.1 * z)     # LeakyReLU(0.1), 2 VALU ops
            h = z
        # One in-kernel XLU transpose: [out_dim, bt] -> natural [bt, out_dim].
        o_ref[...] = h.T.astype(o_ref.dtype)

    return kernel


def _pick_batch_tile(B):
    if B < 256:
        return max(8, _round_up(B, 8))                     # one small tile
    # >= 2 tiles so v7x's two TensorCores both get work; cap at 1024 to avoid
    # vreg spills.  TODO(synk): round num_tiles to even for very large B on v7x.
    return min(1024, _round_up((B + 1) // 2, 128))


def autoencoder_forward(x, params, *, batch_tile=None):
    """x: [B, input_size] float32.  params: list of (W, b) with W [out, in] (PyTorch layout)."""
    B, in_dim = x.shape
    layer_dims = [(int(w.shape[0]), int(w.shape[1])) for (w, _) in params]
    out_dim = layer_dims[-1][0]
    assert layer_dims[0][1] == in_dim

    # Pack the tiny weights/biases into two zero-padded arrays (3 kernel inputs
    # instead of 9).  Padding only touches ~16 KiB of parameters, never x.
    WP = _round_up(max(max(d) for d in layer_dims), 8)
    w_pack = jnp.stack([
        jnp.pad(w.astype(jnp.float32), ((0, WP - w.shape[0]), (0, WP - w.shape[1])))
        for (w, _) in params])
    b_pack = jnp.stack([
        jnp.pad(b.astype(jnp.float32).reshape(-1, 1), ((0, WP - b.shape[0]), (0, 0)))
        for (_, b) in params])

    if batch_tile is None:
        batch_tile = _pick_batch_tile(B)
    assert batch_tile % 8 == 0, "batch_tile must be a multiple of 8 (sublanes)"
    num_tiles = pl.cdiv(B, batch_tile)

    flops = 2 * B * sum(do * di for (do, di) in layer_dims)
    bytes_accessed = 4 * (B * in_dim + B * out_dim + int(w_pack.size) + int(b_pack.size))
    cost = pl.CostEstimate(flops=flops, transcendentals=0, bytes_accessed=bytes_accessed)

    kernel = _make_kernel(layer_dims)

    out = pl.pallas_call(
        kernel,
        out_shape=jax.ShapeDtypeStruct((B, out_dim), x.dtype),
        grid_spec=pltpu.PrefetchScalarGridSpec(
            num_scalar_prefetch=0,
            grid=(num_tiles,),
            in_specs=[
                pl.BlockSpec((batch_tile, in_dim), lambda i: (i, 0)),       # x tile
                pl.BlockSpec(w_pack.shape, lambda i: (0, 0, 0)),            # packed W
                pl.BlockSpec(b_pack.shape, lambda i: (0, 0, 0)),            # packed b
            ],
            out_specs=pl.BlockSpec((batch_tile, out_dim), lambda i: (i, 0)),
        ),
        compiler_params=pltpu.CompilerParams(
            dimension_semantics=("parallel",)),
        cost_estimate=cost,
    )(x, w_pack, b_pack)

    return out


def init_params(key, input_size, ann_structure):
    """Deterministically initialize Linear weights (PyTorch layout [out, in]) and biases."""
    enc_dims = [input_size] + list(ann_structure)                # e.g. [16, 32, 8]
    dec_dims = list(reversed(enc_dims))                          # e.g. [8, 32, 16]
    dec_dims[-1] = input_size                                    # output_size == input_size
    all_dims = list(zip(enc_dims[:-1], enc_dims[1:])) + \
               list(zip(dec_dims[:-1], dec_dims[1:]))
    params = []
    for (din, dout) in all_dims:
        key, kw, kb = jax.random.split(key, 3)
        bound = 1.0 / jnp.sqrt(din)
        w = jax.random.uniform(kw, (dout, din), jnp.float32, -bound, bound)
        b = jax.random.uniform(kb, (dout,), jnp.float32, -bound, bound)
        params.append((w, b))
    return params


def reference_forward(x, params):
    """Pure-JAX reference mirroring the PyTorch module (weights are [out, in])."""
    n = len(params)
    h = x
    for i, (w, b) in enumerate(params):
        h = h @ w.T + b
        if i != n - 1:                 # LeakyReLU after every layer except the last
            h = jnp.where(h >= 0, h, 0.1 * h)
    return h


if __name__ == "__main__":
    # Module configuration: Autoencoder(input_size=16, ann_structure=[32, 8])
    input_size = 16
    ann_structure = [32, 8]
    batch = 512          # auto tile -> 2 tiles of 256 rows (both v7x TCs busy)

    key = jax.random.PRNGKey(0)
    kx, kp = jax.random.split(key)
    x = jax.random.normal(kx, (batch, input_size), dtype=jnp.float32)
    params = init_params(kp, input_size, ann_structure)

    out = autoencoder_forward(x, params)
    out = jax.block_until_ready(out)

    ref = reference_forward(x, params)
    assert out.shape == (batch, input_size)
    assert jnp.allclose(out, ref, atol=1e-4, rtol=1e-5), "mismatch vs reference"

    print("KERNEL_OK")
</pallas_src>

<mosaic_0001>
module attributes {stable_mosaic.version = 11 : i64} {
  func.func @kernel(%arg0: i32, %arg1: memref<256x16xf32, #tpu.memory_space<vmem>>, %arg2: memref<4x32x32xf32, #tpu.memory_space<vmem>>, %arg3: memref<4x32x1xf32, #tpu.memory_space<vmem>>, %arg4: memref<256x16xf32, #tpu.memory_space<vmem>>) attributes {dimension_semantics = [#tpu.dimension_semantics<parallel>], iteration_bounds = array<i64: 2>, scalar_prefetch = 0 : i64, scratch_operands = 0 : i64, tpu.core_type = #tpu.core_type<tc>, window_params = [{transform_indices = @transform_0, window_bounds = array<i64: 256, 16>}, {pipeline_mode = #tpu.pipeline_mode<synchronous>, transform_indices = @transform_1, window_bounds = array<i64: 4, 32, 32>}, {pipeline_mode = #tpu.pipeline_mode<synchronous>, transform_indices = @transform_2, window_bounds = array<i64: 4, 32, 1>}, {transform_indices = @transform_3, window_bounds = array<i64: 256, 16>}]} {
    %c0 = arith.constant 0 : index
    %c0_0 = arith.constant 0 : index
    %0 = vector.load %arg1[%c0, %c0_0] : memref<256x16xf32, #tpu.memory_space<vmem>>, vector<256x16xf32>
    %c0_1 = arith.constant 0 : index
    %c0_2 = arith.constant 0 : index
    %c0_3 = arith.constant 0 : index
    %1 = vector.load %arg2[%c0_1, %c0_2, %c0_3] : memref<4x32x32xf32, #tpu.memory_space<vmem>>, vector<1x32x16xf32>
    %2 = vector.shape_cast %1 : vector<1x32x16xf32> to vector<32x16xf32>
    %c0_4 = arith.constant 0 : index
    %c0_5 = arith.constant 0 : index
    %c0_6 = arith.constant 0 : index
    %3 = vector.load %arg3[%c0_4, %c0_5, %c0_6] : memref<4x32x1xf32, #tpu.memory_space<vmem>>, vector<1x32x1xf32>
    %4 = vector.shape_cast %3 : vector<1x32x1xf32> to vector<32x1xf32>
    %cst = arith.constant dense<0.000000e+00> : vector<32x256xf32>
    %5 = tpu.matmul %2, %0, %cst {dimension_numbers = #tpu.dot_dimension_numbers<[1], [1], [0], [0], [0, 0, 1, 0], [], []>} : vector<32x16xf32>, vector<256x16xf32>, vector<32x256xf32> -> vector<32x256xf32>
    %6 = vector.broadcast %4 : vector<32x1xf32> to vector<32x256xf32>
    %7 = arith.addf %5, %6 : vector<32x256xf32>
    %cst_7 = arith.constant 1.000000e-01 : f32
    %8 = vector.broadcast %cst_7 : f32 to vector<32x256xf32>
    %9 = arith.mulf %8, %7 : vector<32x256xf32>
    %10 = arith.maximumf %7, %9 : vector<32x256xf32>
    %c1 = arith.constant 1 : index
    %c0_8 = arith.constant 0 : index
    %c0_9 = arith.constant 0 : index
    %11 = vector.load %arg2[%c1, %c0_8, %c0_9] : memref<4x32x32xf32, #tpu.memory_space<vmem>>, vector<1x8x32xf32>
    %12 = vector.shape_cast %11 : vector<1x8x32xf32> to vector<8x32xf32>
    %c1_10 = arith.constant 1 : index
    %c0_11 = arith.constant 0 : index
    %c0_12 = arith.constant 0 : index
    %13 = vector.load %arg3[%c1_10, %c0_11, %c0_12] : memref<4x32x1xf32, #tpu.memory_space<vmem>>, vector<1x8x1xf32>
    %14 = vector.shape_cast %13 : vector<1x8x1xf32> to vector<8x1xf32>
    %cst_13 = arith.constant dense<0.000000e+00> : vector<8x256xf32>
    %15 = tpu.matmul %12, %10, %cst_13 {dimension_numbers = #tpu.dot_dimension_numbers<[1], [0], [0], [1], [0, 0, 1, 1], [], []>} : vector<8x32xf32>, vector<32x256xf32>, vector<8x256xf32> -> vector<8x256xf32>
    %16 = vector.broadcast %14 : vector<8x1xf32> to vector<8x256xf32>
    %17 = arith.addf %15, %16 : vector<8x256xf32>
    %cst_14 = arith.constant 1.000000e-01 : f32
    %18 = vector.broadcast %cst_14 : f32 to vector<8x256xf32>
    %19 = arith.mulf %18, %17 : vector<8x256xf32>
    %20 = arith.maximumf %17, %19 : vector<8x256xf32>
    %c2 = arith.constant 2 : index
    %c0_15 = arith.constant 0 : index
    %c0_16 = arith.constant 0 : index
    %21 = vector.load %arg2[%c2, %c0_15, %c0_16] : memref<4x32x32xf32, #tpu.memory_space<vmem>>, vector<1x32x8xf32>
    %22 = vector.shape_cast %21 : vector<1x32x8xf32> to vector<32x8xf32>
    %c2_17 = arith.constant 2 : index
    %c0_18 = arith.constant 0 : index
    %c0_19 = arith.constant 0 : index
    %23 = vector.load %arg3[%c2_17, %c0_18, %c0_19] : memref<4x32x1xf32, #tpu.memory_space<vmem>>, vector<1x32x1xf32>
    %24 = vector.shape_cast %23 : vector<1x32x1xf32> to vector<32x1xf32>
    %cst_20 = arith.constant dense<0.000000e+00> : vector<32x256xf32>
    %25 = tpu.matmul %22, %20, %cst_20 {dimension_numbers = #tpu.dot_dimension_numbers<[1], [0], [0], [1], [0, 0, 1, 1], [], []>} : vector<32x8xf32>, vector<8x256xf32>, vector<32x256xf32> -> vector<32x256xf32>
    %26 = vector.broadcast %24 : vector<32x1xf32> to vector<32x256xf32>
    %27 = arith.addf %25, %26 : vector<32x256xf32>
    %cst_21 = arith.constant 1.000000e-01 : f32
    %28 = vector.broadcast %cst_21 : f32 to vector<32x256xf32>
    %29 = arith.mulf %28, %27 : vector<32x256xf32>
    %30 = arith.maximumf %27, %29 : vector<32x256xf32>
    %c3 = arith.constant 3 : index
    %c0_22 = arith.constant 0 : index
    %c0_23 = arith.constant 0 : index
    %31 = vector.load %arg2[%c3, %c0_22, %c0_23] : memref<4x32x32xf32, #tpu.memory_space<vmem>>, vector<1x16x32xf32>
    %32 = vector.shape_cast %31 : vector<1x16x32xf32> to vector<16x32xf32>
    %c3_24 = arith.constant 3 : index
    %c0_25 = arith.constant 0 : index
    %c0_26 = arith.constant 0 : index
    %33 = vector.load %arg3[%c3_24, %c0_25, %c0_26] : memref<4x32x1xf32, #tpu.memory_space<vmem>>, vector<1x16x1xf32>
    %34 = vector.shape_cast %33 : vector<1x16x1xf32> to vector<16x1xf32>
    %cst_27 = arith.constant dense<0.000000e+00> : vector<16x256xf32>
    %35 = tpu.matmul %32, %30, %cst_27 {dimension_numbers = #tpu.dot_dimension_numbers<[1], [0], [0], [1], [0, 0, 1, 1], [], []>} : vector<16x32xf32>, vector<32x256xf32>, vector<16x256xf32> -> vector<16x256xf32>
    %36 = vector.broadcast %34 : vector<16x1xf32> to vector<16x256xf32>
    %37 = arith.addf %35, %36 : vector<16x256xf32>
    %38 = tpu.transpose %37, [1, 0] : vector<16x256xf32> -> vector<256x16xf32>
    %c0_28 = arith.constant 0 : index
    %c0_29 = arith.constant 0 : index
    %39 = vector.load %arg4[%c0_28, %c0_29] : memref<256x16xf32, #tpu.memory_space<vmem>>, vector<256x16xf32>
    tpu.vector_store %arg4[%c0_28, %c0_29], %38 {strides = array<i32>} : memref<256x16xf32, #tpu.memory_space<vmem>>, vector<256x16xf32>,
    return
  }
  func.func @transform_0(%arg0: i32) -> (i32, i32) {
    %c0_i32 = arith.constant 0 : i32
    %c0_i32_0 = arith.constant 0 : i32
    return %arg0, %c0_i32 : i32, i32
  }
  func.func @transform_1(%arg0: i32) -> (i32, i32, i32) {
    %c0_i32 = arith.constant 0 : i32
    %c0_i32_0 = arith.constant 0 : i32
    %c0_i32_1 = arith.constant 0 : i32
    %c0_i32_2 = arith.constant 0 : i32
    return %c0_i32, %c0_i32_0, %c0_i32_1 : i32, i32, i32
  }
  func.func @transform_2(%arg0: i32) -> (i32, i32, i32) {
    %c0_i32 = arith.constant 0 : i32
    %c0_i32_0 = arith.constant 0 : i32
    %c0_i32_1 = arith.constant 0 : i32
    %c0_i32_2 = arith.constant 0 : i32
    return %c0_i32, %c0_i32_0, %c0_i32_1 : i32, i32, i32
  }
  func.func @transform_3(%arg0: i32) -> (i32, i32) {
    %c0_i32 = arith.constant 0 : i32
    %c0_i32_0 = arith.constant 0 : i32
    return %arg0, %c0_i32 : i32, i32
  }
}

</mosaic_0001>

<bundles_post_ra>
// kernel: tpu_custom_call.1
= control target key start
LH: loop header
LB: loop body
LE: loop exit
PB: predicated region body
PF: predicated region fallthrough
CT: control target
= control target key end

     0   :  { %s1149_s12 = smov 0   ;;  %s1399_s0 = inlined_call_operand.vmem [shape: f32[512,16], index: 0, kind: input, shape index: {}]   ;;  %s1400_s1 = inlined_call_operand.vmem [shape: f32[4,32,32], index: 1, kind: input, shape index: {}]   ;;  %s1401_s2 = inlined_call_operand.vmem [shape: f32[4,32,1], index: 2, kind: input, shape index: {}]   ;;  %s1402_s3 = inlined_call_operand.vmem [shape: f32[512,16], index: 3, kind: output, shape index: {}]  }
   0x1 LB: > { %s935_s13 = sadd.s32 4294967295, %s1125_s12   ;;  %p939_p0 = scmp.ge.s32.totalorder %s1125_s12, 1  ;;  %s1125_s12 = sphi %s1149_s12, %s13_s12  }
   0x2   : > { %p138_p1 = scmp.lt.s32.totalorder %s1125_s12, 3 }
   0x4   : > { %p139_p2 = pnand %p939_p0, %p138_p1 }
   0x5   : > { %s940_s14 = sshll.u32 (!%p139_p2), %s935_s13, 5  ;;  %vm234_vm0 = vcmask (!%p139_p2), 130048   ;;  %v1160_v0 = vld [vmem:[%s1400_s1] sm:$0xff] (!%p139_p2)  ;;  %v1127_v1 = vmov (!%p139_p2), 0   ;;  %v212_v3 = vld [vmem:[%s1401_s2 + $0x10] sm:$0xff] (!%p139_p2)  ;;  %v211_v4 = vld [vmem:[%s1401_s2 + $0x8] sm:$0xff] (!%p139_p2) }
   0x6   : > { %142 = sbr.rel (%p139_p2) target bundleno = 1183 (0x49f), region = 32  ;;  %p163_p3 = scmp.lt.s32.totalorder (!%p139_p2), %s940_s14, 63  ;;  %1035 = vmatprep.mubr.msk.f32.mxu0 (!%p139_p2), %vm234_vm0, %v1160_v0  ;;  %1117 = vset.pattern.permute.xlu0 (!%p139_p2), %v1127_v1  ;;  %v210_v2 = vld [vmem:[%s1401_s2] sm:$0xff] (!%p139_p2)  ;;  %v213_v5 = vld [vmem:[%s1401_s2 + $0x18] sm:$0xff] (!%p139_p2)  ;;  %vm1188_vm1 = vmpackc.low (!%p139_p2), %vm234_vm0, %vm234_vm0  ;;  %vm457_vm2 = vcmask (!%p139_p2), 261120   ;;  %vm566_vm3 = vcmask (!%p139_p2), 64512  }
   0x7   : > { %216 = vperm.xlu0 (!%p139_p2), %1117, %v210_v2   ;;  %1118 = vset.pattern.permute.xlu1 (!%p139_p2), %v1127_v1  ;;  %v981_v7 = vld [vmem:[%s1401_s2 + $0x20] sm:$0xff] (!%p139_p2)  ;;  %v988_v18 = vld [vmem:[%s1401_s2 + $0x48] sm:$0xff] (!%p139_p2)  ;;  %v989_v21 = vld [vmem:[%s1401_s2 + $0x50] sm:$0xff] (!%p139_p2) }
   0x8   : > { %226 = vperm.xlu1 (!%p139_p2), %1118, %v212_v3   ;;  %v987_v8 = vld [vmem:[%s1401_s2 + $0x40] sm:$0xff] (!%p139_p2)  ;;  %v990_v25 = vld [vmem:[%s1401_s2 + $0x58] sm:$0xff] (!%p139_p2)  ;;  %v998_v28 = vld [vmem:[%s1401_s2 + $0x68] sm:$0xff] (!%p139_p2) }
   0x9   : > { %v997_v27 = vld [vmem:[%s1401_s2 + $0x60] sm:$0xff] (!%p139_p2)  ;;  %v207_v62 = vld [vmem:[%s1400_s1 + $0x8] sm:$0xff] (!%p139_p2)  ;;  %v208_v63 = vld [vmem:[%s1400_s1 + $0x10] sm:$0xff] (!%p139_p2) }
   0xa   : > { %v209_v1 = vld [vmem:[%s1400_s1 + $0x18] sm:$0xff] (!%p139_p2) }
   0xb   : > { %221 = vperm.xlu0 (!%p139_p2), %1117, %v211_v4  }
   0xc   : > { %231 = vperm.xlu1 (!%p139_p2), %1118, %v213_v5  }
   0xd   : > { %s1406_s14 = smov (!%p163_p3, %s940_s14), 63 }
   0xe   : > { %s941_s25 = sshll.u32 %s1406_s14, 3 }
   0xf   : > { %s1184_s28 = scalar_lea.vmem %s1399_s0, %s941_s25  ;;  %454 = vperm.xlu0 %1117, %v981_v7   ;;  %s1330_s16 = scalar_lea.vmem %s1402_s3, %s941_s25 }
  0x10   : > { %v190_v9 = vld [vmem:[%s1184_s28 + $0x80] sm:$0xff]  ;;  %v191_v10 = vld [vmem:[%s1184_s28 + $0x88] sm:$0xff]  ;;  %v192_v14 = vld [vmem:[%s1184_s28 + $0x90] sm:$0xff]  ;;  %548 = vperm.xlu1 %1118, %v987_v8  }
  0x11   : > { %v174_v11 = vld [vmem:[%s1184_s28] sm:$0xff]  ;;  %v1043_v12 = vpack.c.bf16 %v191_v10, %v190_v9  ;;  %v175_v13 = vld [vmem:[%s1184_s28 + $0x8] sm:$0xff]  ;;  %v193_v15 = vld [vmem:[%s1184_s28 + $0x98] sm:$0xff] }
  0x12   : > { %v1046_v16 = vpack.c.bf16 %v175_v13, %v174_v11  ;;  %v1049_v17 = vpack.c.bf16 %v193_v15, %v192_v14  ;;  %v176_v19 = vld [vmem:[%s1184_s28 + $0x10] sm:$0xff]  ;;  %v177_v20 = vld [vmem:[%s1184_s28 + $0x18] sm:$0xff]  ;;  %v194_v22 = vld [vmem:[%s1184_s28 + $0xa0] sm:$0xff] }
  0x13   : > { %1045 = vmatprep.subr.msk.bf16.mxu0 %vm1188_vm1, %v1043_v12  ;;  %v195_v23 = vld [vmem:[%s1184_s28 + $0xa8] sm:$0xff]  ;;  %553 = vperm.xlu0 %1117, %v988_v18   ;;  %v1052_v24 = vpack.c.bf16 %v177_v20, %v176_v19  ;;  %v178_v29 = vld [vmem:[%s1184_s28 + $0x20] sm:$0xff]  ;;  %v196_v31 = vld [vmem:[%s1184_s28 + $0xb0] sm:$0xff] }
  0x14   : > { %1048 = vmatpush3.bf16.xpose.msk.msra.mxu0 %vm1188_vm1, %v1046_v16  ;;  %558 = vperm.xlu1 %1118, %v989_v21   ;;  %v1055_v26 = vpack.c.bf16 %v195_v23, %v194_v22  ;;  %v179_v30 = vld [vmem:[%s1184_s28 + $0x28] sm:$0xff]  ;;  %v197_v32 = vld [vmem:[%s1184_s28 + $0xb8] sm:$0xff]  ;;  %v180_v35 = vld [vmem:[%s1184_s28 + $0x30] sm:$0xff] }
  0x15   : > { %1051 = vmatprep.subr.msk.bf16.mxu0 %vm1188_vm1, %v1049_v17  ;;  %v1058_v33 = vpack.c.bf16 %v179_v30, %v178_v29  ;;  %v1061_v34 = vpack.c.bf16 %v197_v32, %v196_v31  ;;  %v181_v36 = vld [vmem:[%s1184_s28 + $0x38] sm:$0xff]  ;;  %v198_v37 = vld [vmem:[%s1184_s28 + $0xc0] sm:$0xff]  ;;  %v199_v38 = vld [vmem:[%s1184_s28 + $0xc8] sm:$0xff] }
  0x16   : > { %v1064_v39 = vpack.c.bf16 %v181_v36, %v180_v35  ;;  %v1067_v40 = vpack.c.bf16 %v199_v38, %v198_v37  ;;  %v182_v41 = vld [vmem:[%s1184_s28 + $0x40] sm:$0xff]  ;;  %v183_v42 = vld [vmem:[%s1184_s28 + $0x48] sm:$0xff]  ;;  %v200_v43 = vld [vmem:[%s1184_s28 + $0xd0] sm:$0xff] }
  0x17   : > { %563 = vperm.xlu0 %1117, %v990_v25   ;;  %v201_v44 = vld [vmem:[%s1184_s28 + $0xd8] sm:$0xff]  ;;  %v1070_v45 = vpack.c.bf16 %v183_v42, %v182_v41  ;;  %v184_v47 = vld [vmem:[%s1184_s28 + $0x50] sm:$0xff]  ;;  %v202_v49 = vld [vmem:[%s1184_s28 + $0xe0] sm:$0xff] }
  0x18   : > { %692 = vperm.xlu1 %1118, %v997_v27   ;;  %v1073_v46 = vpack.c.bf16 %v201_v44, %v200_v43  ;;  %v185_v48 = vld [vmem:[%s1184_s28 + $0x58] sm:$0xff]  ;;  %v203_v50 = vld [vmem:[%s1184_s28 + $0xe8] sm:$0xff]  ;;  %v186_v53 = vld [vmem:[%s1184_s28 + $0x60] sm:$0xff] }
  0x19   : > { %v1076_v51 = vpack.c.bf16 %v185_v48, %v184_v47  ;;  %v1079_v52 = vpack.c.bf16 %v203_v50, %v202_v49  ;;  %v187_v54 = vld [vmem:[%s1184_s28 + $0x68] sm:$0xff]  ;;  %v204_v55 = vld [vmem:[%s1184_s28 + $0xf0] sm:$0xff]  ;;  %v205_v56 = vld [vmem:[%s1184_s28 + $0xf8] sm:$0xff] }
  0x1a   : > { %v1082_v57 = vpack.c.bf16 %v187_v54, %v186_v53  ;;  %v1085_v58 = vpack.c.bf16 %v205_v56, %v204_v55  ;;  %v188_v59 = vld [vmem:[%s1184_s28 + $0x70] sm:$0xff]  ;;  %v189_v60 = vld [vmem:[%s1184_s28 + $0x78] sm:$0xff]  ;;  %v980_v42 = vld [vmem:[%s1400_s1 + $0x20] sm:$0xff] }
  0x1b   : > { %697 = vperm.xlu0 %1117, %v998_v28   ;;  %v1088_v61 = vpack.c.bf16 %v189_v60, %v188_v59  ;;  %v984_v53 = vld [vmem:[%s1400_s1 + $0x48] sm:$0xff]  ;;  %v985_v54 = vld [vmem:[%s1400_s1 + $0x50] sm:$0xff]  ;;  %v986_v55 = vld [vmem:[%s1400_s1 + $0x58] sm:$0xff] }
  0x1c   : > { %1054 = vmatpush3.bf16.xpose.msk.msra.mxu0 %vm1188_vm1, %v1052_v24 }
  0x1d   : > { %1057 = vmatprep.subr.msk.bf16.mxu0 %vm1188_vm1, %v1055_v26 }
  0x24   : > { %1060 = vmatpush3.bf16.xpose.msk.msra.mxu0 %vm1188_vm1, %v1058_v33 }
  0x25   : > { %1063 = vmatprep.subr.msk.bf16.mxu0 %vm1188_vm1, %v1061_v34 }
  0x2c   : > { %1066 = vmatpush3.bf16.xpose.msk.msra.mxu0 %vm1188_vm1, %v1064_v39 }
  0x2d   : > { %1069 = vmatprep.subr.msk.bf16.mxu0 %vm1188_vm1, %v1067_v40 }
  0x34   : > { %1072 = vmatpush3.bf16.xpose.msk.msra.mxu0 %vm1188_vm1, %v1070_v45 }
  0x35   : > { %1075 = vmatprep.subr.msk.bf16.mxu0 %vm1188_vm1, %v1073_v46 }
  0x3c   : > { %1078 = vmatpush3.bf16.xpose.msk.msra.mxu0 %vm1188_vm1, %v1076_v51 }
  0x3d   : > { %1081 = vmatprep.subr.msk.bf16.mxu0 %vm1188_vm1, %v1079_v52  ;;  %v983_v52 = vld [vmem:[%s1400_s1 + $0x40] sm:$0xff] }
  0x44   : > { %1084 = vmatpush3.bf16.xpose.msk.msra.mxu0 %vm1188_vm1, %v1082_v57 }
  0x45   : > { %1087 = vmatprep.subr.msk.bf16.mxu0 %vm1188_vm1, %v1085_v58 }
  0x4c   : > { %1090 = vmatpush3.bf16.xpose.msk.msra.mxu0 %vm1188_vm1, %v1088_v61 }
  0x53   : > { %1036 = vmatmul.mubr.msk.f32.vlgmr.msra.gmra.mrb[0].mxu0 %vm234_vm0, %v1160_v0  ;;  %v1128_v0 = vmov 0.0  }
  0x54   : > { %1037 = vmatprep.mubr.msk.f32.mxu0 %vm234_vm0, %v207_v62  ;;  %525 = vmatprep.mubr.f32.mxu1 %v1128_v0 }
  0x57   : > { %1038 = vmatmul.mubr.msk.f32.gmra.mrb[2].mxu0 %vm234_vm0, %v207_v62 }
  0x58   : > { %1039 = vmatprep.mubr.msk.f32.mxu0 %vm234_vm0, %v208_v63 }
  0x5b   : > { %1040 = vmatmul.mubr.msk.f32.gmra.mrb[4].mxu0 %vm234_vm0, %v208_v63 }
  0x5c   : > { %1041 = vmatprep.mubr.msk.f32.mxu0 %vm234_vm0, %v209_v1 }
  0x5f   : > { %1042 = vmatmul.mubr.msk.f32.gmra.mrb[6].mxu0 %vm234_vm0, %v209_v1 }
  0x86   : > { %v217_v2 = vpop.permute.xlu0 %216 }
  0x87   : > { %v227_v12 = vpop.permute.xlu1 %226 }
  0x8a   : > { %v222_v7 = vpop.permute.xlu0 %221 }
  0x8b   : > { %v232_v26 = vpop.permute.xlu1 %231 }
  0x8e   : > { %v455_v43 = vpop.permute.xlu0 %454 }
  0x8f   : > { %v549_v56 = vpop.permute.xlu1 %548 }
  0x92   : > { %v554_v61 = vpop.permute.xlu0 %553 }
 0x126   : > { %v409_v3 = vpop.f32.mrb[0].mxu0 }
 0x127   : > { %v410_v4 = vadd.f32 %v409_v3, %v217_v2  ;;  %v411_v5 = vpop.f32.mrb[1].mxu0 }
 0x128   : > { %v412_v6 = vadd.f32 %v411_v5, %v217_v2 }
 0x129   : > { %v432_v9 = vmul.f32 0.1, %v410_v4 }
 0x12a   : > { %v415_v8 = vpop.f32.mrb[2].mxu0  ;;  %v433_v13 = vmul.f32 0.1, %v412_v6 }
 0x12b   : > { %v416_v10 = vadd.f32 %v415_v8, %v222_v7  ;;  %v417_v11 = vpop.f32.mrb[3].mxu0  ;;  %v440_v18 = vmax.f32 %v410_v4, %v432_v9 }
 0x12c   : > { %v418_v14 = vadd.f32 %v417_v11, %v222_v7  ;;  %v441_v23 = vmax.f32 %v412_v6, %v433_v13  ;;  %v559_v6 = vpop.permute.xlu1 %558 }
 0x12d   : > { %v434_v15 = vmul.f32 0.1, %v416_v10 }
 0x12e   : > { %v435_v16 = vmul.f32 0.1, %v418_v14  ;;  %v421_v17 = vpop.f32.mrb[4].mxu0 }
 0x12f   : > { %v442_v19 = vmax.f32 %v416_v10, %v434_v15  ;;  %v422_v20 = vadd.f32 %v421_v17, %v227_v12  ;;  %v423_v21 = vpop.f32.mrb[5].mxu0  ;;  %v564_v17 = vpop.permute.xlu0 %563 }
 0x130   : > { %v424_v22 = vadd.f32 %v423_v21, %v227_v12  ;;  %v443_v24 = vmax.f32 %v418_v14, %v435_v16 }
 0x131   : > { %v1093_v25 = vpack.c.bf16 %v442_v19, %v440_v18  ;;  %v436_v29 = vmul.f32 0.1, %v422_v20 }
 0x132   : > { %v427_v27 = vpop.f32.mrb[6].mxu0  ;;  %v1091_v28 = vpack.c.bf16 %v443_v24, %v441_v23  ;;  %v437_v32 = vmul.f32 0.1, %v424_v22 }
 0x133   : > { %v428_v30 = vadd.f32 %v427_v27, %v232_v26  ;;  %v429_v31 = vpop.f32.mrb[7].mxu0  ;;  %v444_v36 = vmax.f32 %v422_v20, %v436_v29 }
 0x134   : > { %v430_v33 = vadd.f32 %v429_v31, %v232_v26  ;;  %1092 = vmatprep.subr.bf16.mxu1 %v1091_v28  ;;  %v445_v38 = vmax.f32 %v424_v22, %v437_v32 }
 0x135   : > { %v438_v34 = vmul.f32 0.1, %v428_v30  ;;  %1094 = vmatpush1.bf16.msra.mxu1 %v1093_v25 }
 0x136   : > { %v439_v35 = vmul.f32 0.1, %v430_v33 }
 0x137   : > { %v446_v37 = vmax.f32 %v428_v30, %v438_v34  ;;  %v996_v34 = vld [vmem:[%s1400_s1 + $0x68] sm:$0xff] }
 0x138   : > { %v447_v39 = vmax.f32 %v430_v33, %v439_v35  ;;  %v995_v33 = vld [vmem:[%s1400_s1 + $0x60] sm:$0xff]  ;;  %v693_v35 = vpop.permute.xlu1 %692 }
 0x139   : > { %v1097_v40 = vpack.c.bf16 %v446_v37, %v444_v36 }
 0x13a   : > { %v1095_v41 = vpack.c.bf16 %v447_v39, %v445_v38 }
 0x13c   : > { %1096 = vmatprep.subr.bf16.mxu1 %v1095_v41 }
 0x13d   : > { %1098 = vmatpush1.bf16.msra.mxu1 %v1097_v40  ;;  %v698_v40 = vpop.permute.xlu0 %697 }
 0x140   : > { %982 = vmatmul.mubr.msk.f32.vlgmr.msra.gmra.mrb[0].mxu1 %vm457_vm2, %v980_v42 }
 0x141   : > { %643 = vmatprep.mubr.f32.mxu1 %v1128_v0 }
 0x213   : > { %v527_v44 = vpop.f32.mrb[0].mxu1 }
 0x214   : > { %v528_v45 = vadd.f32 %v527_v44, %v455_v43  ;;  %v529_v46 = vpop.f32.mrb[1].mxu1 }
 0x215   : > { %v530_v47 = vadd.f32 %v529_v46, %v455_v43 }
 0x216   : > { %v532_v48 = vmul.f32 0.1, %v528_v45 }
 0x217   : > { %v533_v49 = vmul.f32 0.1, %v530_v47 }
 0x218   : > { %v534_v51 = vmax.f32 %v528_v45, %v532_v48 }
 0x219   : > { %v535_v50 = vmax.f32 %v530_v47, %v533_v49 }
 0x21b   : > { %579 = vmatprep.subr.mxu1 %v535_v50 }
 0x21c   : > { %580 = vmatpush1.msra.mxu1 %v534_v51 }
 0x21d   : > { %991 = vmatmul.mubr.msk.f32.vlgmr.msra.gmra.mrb[2].mxu1 %vm566_vm3, %v983_v52 }
 0x21e   : > { %649 = vmatprep.mubr.f32.mxu1 %v1128_v0 }
 0x221   : > { %992 = vmatmul.mubr.msk.f32.gmra.mrb[4].mxu1 %vm566_vm3, %v984_v53 }
 0x222   : > { %655 = vmatprep.mubr.f32.mxu1 %v1128_v0 }
 0x225   : > { %993 = vmatmul.mubr.msk.f32.gmra.mrb[6].mxu1 %vm566_vm3, %v985_v54 }
 0x226   : > { %661 = vmatprep.mubr.f32.mxu1 %v1128_v0 }
 0x229   : > { %994 = vmatmul.mubr.msk.f32.gmra.mrb[8].mxu1 %vm566_vm3, %v986_v55 }
 0x22a   : > { %770 = vmatprep.mubr.f32.mxu1 %v1128_v0 }
 0x2f0   : > { %v645_v57 = vpop.f32.mrb[2].mxu1 }
 0x2f1   : > { %v646_v58 = vadd.f32 %v645_v57, %v549_v56  ;;  %v647_v59 = vpop.f32.mrb[3].mxu1 }
 0x2f2   : > { %v648_v60 = vadd.f32 %v647_v59, %v549_v56 }
 0x2f3   : > { %v668_v63 = vmul.f32 0.1, %v646_v58 }
 0x2f4   : > { %v651_v62 = vpop.f32.mrb[4].mxu1  ;;  %v669_v3 = vmul.f32 0.1, %v648_v60 }
 0x2f5   : > { %v652_v1 = vadd.f32 %v651_v62, %v554_v61  ;;  %v653_v2 = vpop.f32.mrb[5].mxu1  ;;  %v676_v9 = vmax.f32 %v646_v58, %v668_v63 }
 0x2f6   : > { %v654_v4 = vadd.f32 %v653_v2, %v554_v61  ;;  %v677_v13 = vmax.f32 %v648_v60, %v669_v3 }
 0x2f7   : > { %v670_v5 = vmul.f32 0.1, %v652_v1 }
 0x2f8   : > { %v671_v7 = vmul.f32 0.1, %v654_v4  ;;  %v657_v8 = vpop.f32.mrb[6].mxu1 }
 0x2f9   : > { %v678_v10 = vmax.f32 %v652_v1, %v670_v5  ;;  %v658_v11 = vadd.f32 %v657_v8, %v559_v6  ;;  %v659_v12 = vpop.f32.mrb[7].mxu1 }
 0x2fa   : > { %v679_v14 = vmax.f32 %v654_v4, %v671_v7  ;;  %v660_v15 = vadd.f32 %v659_v12, %v559_v6 }
 0x2fb   : > { %v1101_v16 = vpack.c.bf16 %v678_v10, %v676_v9  ;;  %v672_v20 = vmul.f32 0.1, %v658_v11 }
 0x2fc   : > { %v663_v18 = vpop.f32.mrb[8].mxu1  ;;  %v1099_v19 = vpack.c.bf16 %v679_v14, %v677_v13  ;;  %v673_v23 = vmul.f32 0.1, %v660_v15 }
 0x2fd   : > { %v664_v21 = vadd.f32 %v663_v18, %v564_v17  ;;  %v665_v22 = vpop.f32.mrb[9].mxu1  ;;  %v680_v27 = vmax.f32 %v658_v11, %v672_v20 }
 0x2fe   : > { %v666_v24 = vadd.f32 %v665_v22, %v564_v17  ;;  %1100 = vmatprep.subr.bf16.mxu1 %v1099_v19  ;;  %v681_v29 = vmax.f32 %v660_v15, %v673_v23 }
 0x2ff   : > { %v674_v25 = vmul.f32 0.1, %v664_v21  ;;  %1102 = vmatpush1.bf16.msra.mxu1 %v1101_v16 }
 0x300   : > { %v675_v26 = vmul.f32 0.1, %v666_v24 }
 0x301   : > { %v682_v28 = vmax.f32 %v664_v21, %v674_v25 }
 0x302   : > { %v683_v30 = vmax.f32 %v666_v24, %v675_v26 }
 0x303   : > { %v1105_v31 = vpack.c.bf16 %v682_v28, %v680_v27 }
 0x304   : > { %v1103_v32 = vpack.c.bf16 %v683_v30, %v681_v29 }
 0x306   : > { %1104 = vmatprep.subr.bf16.mxu1 %v1103_v32 }
 0x307   : > { %1106 = vmatpush1.bf16.msra.mxu1 %v1105_v31 }
 0x30a   : > { %999 = vmatmul.mubr.msk.f32.vlgmr.msra.gmra.mrb[10].mxu1 %vm457_vm2, %v995_v33 }
 0x30b   : > { %776 = vmatprep.mubr.f32.mxu1 %v1128_v0 }
 0x30e   : > { %1000 = vmatmul.mubr.msk.f32.gmra.mrb[12].mxu1 %vm457_vm2, %v996_v34 }
 0x3dd   : > { %v772_v36 = vpop.f32.mrb[10].mxu1 }
 0x3de   : > { %v773_v37 = vadd.f32 %v772_v36, %v693_v35  ;;  %v774_v38 = vpop.f32.mrb[11].mxu1 }
 0x3df   : > { %v775_v39 = vadd.f32 %v774_v38, %v693_v35 }
 0x3e0   : > { %783 = vxpose.xlu1.b32.start [1/2] (short) %v773_v37, 128 }
 0x3e1   : > { %v778_v41 = vpop.f32.mrb[12].mxu1  ;;  %815 = vxpose.xlu0.b32.start [1/2] (short) %v775_v39, 128 }
 0x3e2   : > { %v779_v42 = vadd.f32 %v778_v41, %v698_v40  ;;  %v780_v43 = vpop.f32.mrb[13].mxu1 }
 0x3e3   : > { %v781_v44 = vadd.f32 %v780_v43, %v698_v40 }
 0x3e4   : > { %784 = vxpose.xlu1.b32.end [2/2] (short) %v779_v42, 128 }
 0x3e5   : > { %816 = vxpose.xlu0.b32.end [2/2] (short) %v781_v44, 128 }
 0x460   : > { %v799_v0 = vpop.trf.xlu1 }
 0x461   : > { %v831_v45 = vpop.trf.xlu0  ;;  %847 = vst.msk [vmem:[%s1330_s16] sm:$0xff] %vm234_vm0, %v799_v0 }
 0x462   : > { %863 = vst.msk [vmem:[%s1330_s16 + $0x80] sm:$0xff] %vm234_vm0, %v831_v45 }
 0x464   : > { %v800_v46 = vpop.trf.xlu1 }
 0x465   : > { %v832_v47 = vpop.trf.xlu0  ;;  %848 = vst.msk [vmem:[%s1330_s16 + $0x8] sm:$0xff] %vm234_vm0, %v800_v46 }
 0x466   : > { %864 = vst.msk [vmem:[%s1330_s16 + $0x88] sm:$0xff] %vm234_vm0, %v832_v47 }
 0x468   : > { %v801_v48 = vpop.trf.xlu1 }
 0x469   : > { %v833_v49 = vpop.trf.xlu0  ;;  %849 = vst.msk [vmem:[%s1330_s16 + $0x10] sm:$0xff] %vm234_vm0, %v801_v48 }
 0x46a   : > { %865 = vst.msk [vmem:[%s1330_s16 + $0x90] sm:$0xff] %vm234_vm0, %v833_v49 }
 0x46c   : > { %v802_v50 = vpop.trf.xlu1 }
 0x46d   : > { %v834_v51 = vpop.trf.xlu0  ;;  %850 = vst.msk [vmem:[%s1330_s16 + $0x18] sm:$0xff] %vm234_vm0, %v802_v50 }
 0x46e   : > { %866 = vst.msk [vmem:[%s1330_s16 + $0x98] sm:$0xff] %vm234_vm0, %v834_v51 }
 0x470   : > { %v803_v52 = vpop.trf.xlu1 }
 0x471   : > { %v835_v53 = vpop.trf.xlu0  ;;  %851 = vst.msk [vmem:[%s1330_s16 + $0x20] sm:$0xff] %vm234_vm0, %v803_v52 }
 0x472   : > { %867 = vst.msk [vmem:[%s1330_s16 + $0xa0] sm:$0xff] %vm234_vm0, %v835_v53 }
 0x474   : > { %v804_v54 = vpop.trf.xlu1 }
 0x475   : > { %v836_v55 = vpop.trf.xlu0  ;;  %852 = vst.msk [vmem:[%s1330_s16 + $0x28] sm:$0xff] %vm234_vm0, %v804_v54 }
 0x476   : > { %868 = vst.msk [vmem:[%s1330_s16 + $0xa8] sm:$0xff] %vm234_vm0, %v836_v55 }
 0x478   : > { %v805_v56 = vpop.trf.xlu1 }
 0x479   : > { %v837_v57 = vpop.trf.xlu0  ;;  %853 = vst.msk [vmem:[%s1330_s16 + $0x30] sm:$0xff] %vm234_vm0, %v805_v56 }
 0x47a   : > { %869 = vst.msk [vmem:[%s1330_s16 + $0xb0] sm:$0xff] %vm234_vm0, %v837_v57 }
 0x47c   : > { %v806_v58 = vpop.trf.xlu1 }
 0x47d   : > { %v838_v59 = vpop.trf.xlu0  ;;  %854 = vst.msk [vmem:[%s1330_s16 + $0x38] sm:$0xff] %vm234_vm0, %v806_v58 }
 0x47e   : > { %870 = vst.msk [vmem:[%s1330_s16 + $0xb8] sm:$0xff] %vm234_vm0, %v838_v59 }
 0x480   : > { %v807_v60 = vpop.trf.xlu1 }
 0x481   : > { %v839_v61 = vpop.trf.xlu0  ;;  %855 = vst.msk [vmem:[%s1330_s16 + $0x40] sm:$0xff] %vm234_vm0, %v807_v60 }
 0x482   : > { %871 = vst.msk [vmem:[%s1330_s16 + $0xc0] sm:$0xff] %vm234_vm0, %v839_v61 }
 0x484   : > { %v808_v62 = vpop.trf.xlu1 }
 0x485   : > { %v840_v63 = vpop.trf.xlu0  ;;  %856 = vst.msk [vmem:[%s1330_s16 + $0x48] sm:$0xff] %vm234_vm0, %v808_v62 }
 0x486   : > { %872 = vst.msk [vmem:[%s1330_s16 + $0xc8] sm:$0xff] %vm234_vm0, %v840_v63 }
 0x488   : > { %v809_v1 = vpop.trf.xlu1 }
 0x489   : > { %v841_v2 = vpop.trf.xlu0  ;;  %857 = vst.msk [vmem:[%s1330_s16 + $0x50] sm:$0xff] %vm234_vm0, %v809_v1 }
 0x48a   : > { %873 = vst.msk [vmem:[%s1330_s16 + $0xd0] sm:$0xff] %vm234_vm0, %v841_v2 }
 0x48c   : > { %v810_v3 = vpop.trf.xlu1 }
 0x48d   : > { %v842_v4 = vpop.trf.xlu0  ;;  %858 = vst.msk [vmem:[%s1330_s16 + $0x58] sm:$0xff] %vm234_vm0, %v810_v3 }
 0x48e   : > { %874 = vst.msk [vmem:[%s1330_s16 + $0xd8] sm:$0xff] %vm234_vm0, %v842_v4 }
 0x490   : > { %v811_v5 = vpop.trf.xlu1 }
 0x491   : > { %v843_v6 = vpop.trf.xlu0  ;;  %859 = vst.msk [vmem:[%s1330_s16 + $0x60] sm:$0xff] %vm234_vm0, %v811_v5 }
 0x492   : > { %875 = vst.msk [vmem:[%s1330_s16 + $0xe0] sm:$0xff] %vm234_vm0, %v843_v6 }
 0x494   : > { %v812_v7 = vpop.trf.xlu1 }
 0x495   : > { %v844_v8 = vpop.trf.xlu0  ;;  %860 = vst.msk [vmem:[%s1330_s16 + $0x68] sm:$0xff] %vm234_vm0, %v812_v7 }
 0x496   : > { %876 = vst.msk [vmem:[%s1330_s16 + $0xe8] sm:$0xff] %vm234_vm0, %v844_v8 }
 0x498   : > { %v813_v9 = vpop.trf.xlu1 }
 0x499   : > { %v845_v10 = vpop.trf.xlu0  ;;  %861 = vst.msk [vmem:[%s1330_s16 + $0x70] sm:$0xff] %vm234_vm0, %v813_v9 }
 0x49a   : > { %877 = vst.msk [vmem:[%s1330_s16 + $0xf0] sm:$0xff] %vm234_vm0, %v845_v10 }
 0x49c   : > { %v814_v11 = vpop.trf.xlu1 }
 0x49d   : > { %v846_v12 = vpop.trf.xlu0  ;;  %862 = vst.msk [vmem:[%s1330_s16 + $0x78] sm:$0xff] %vm234_vm0, %v814_v11 }
 0x49e   : > { %878 = vst.msk [vmem:[%s1330_s16 + $0xf8] sm:$0xff] %vm234_vm0, %v846_v12 }
 0x49f PF: > { %s13_s12 = sadd.s32 1, %s1125_s12  }
 0x4a0   : > { %p10_p4 = scmp.ge.s32.totalorder %s13_s12, 4  }
 0x4a2   :  { %12 = sbr.rel (!%p10_p4) target bundleno = 1 (0x1), region = 68 }

</bundles_post_ra>
